<compile_context>
chip_gen: v6e
topology: v6e:2x2x1
jax: 0.10.0
libtpu: 0.0.40
codegen_flags: <defaults>
</compile_context>

<pallas_src>
import functools
import math
from typing import Tuple

import jax
import jax.numpy as jnp
from jax.experimental import pallas as pl
from jax.experimental.pallas import tpu as pltpu


_LANE = 128
_TARGET_BLOCK_BYTES = 4 * 1024 * 1024   # ~4 MiB/block -> ~16 MiB with in+out double buffering
_VMEM_LIMIT_BYTES = 32 * 1024 * 1024    # scoped-VMEM budget safe on v5e/v6e/v7x


# ----------------------------- kernel body ---------------------------------

def _drop_path_kernel(tb: int, scale_ref, x_ref, o_ref):
    # scale_ref: (B_pad, 1) in x.dtype, resident in VMEM (same block every step).
    # x_ref / o_ref: (TB, TF) tiles; ragged boundary tiles are masked by Pallas.
    i = pl.program_id(0)
    row0 = pl.multiple_of(i * tb, tb)
    s = scale_ref[pl.ds(row0, tb), :]            # (TB, 1), no per-tile cast
    o_ref[...] = x_ref[...] * s


# --------------------------- tile-size selection ----------------------------

def _choose_tiles(B: int, F: int, itemsize: int) -> Tuple[int, int]:
    # Native sublane packing: 8 rows for 32-bit, 16 for bf16, 32 for int8/fp8.
    sublane = max(8, 32 // max(1, itemsize))
    tb_cap = 256
    if B <= tb_cap:
        TB = B                                    # full-extent dim: always legal
    else:
        TB = (tb_cap // sublane) * sublane        # multiple of the native sublane tile

    if F < _LANE:
        TF = F                                    # full-extent last dim: always legal
    else:
        tf_budget = _TARGET_BLOCK_BYTES // max(1, TB * itemsize)
        tf_budget = max(_LANE, (tf_budget // _LANE) * _LANE)
        f_floor = (F // _LANE) * _LANE            # largest 128-multiple <= F
        TF = max(_LANE, min(tf_budget, f_floor))
        # Guarantee >= 2 tiles along a "parallel" axis so both v7x TensorCores
        # stream (a (1,1) grid leaves one core idle on the shared HBM).
        if pl.cdiv(B, TB) == 1 and pl.cdiv(F, TF) == 1 and F >= 2 * _LANE:
            TF = max(_LANE, ((F // 2) // _LANE) * _LANE)
    return TB, TF


# ------------------------------- wrapper ------------------------------------

def drop_path(x: jax.Array, drop_prob: float, key: jax.Array,
              training: bool = True) -> jax.Array:
    """Pallas TPU DropPath. Matches PyTorch DropPath.forward semantics."""
    if drop_prob == 0.0 or not training:
        return x
    keep_prob = 1.0 - drop_prob

    orig_shape = x.shape
    B = orig_shape[0]
    F = math.prod(orig_shape[1:])
    xf = x.reshape(B, F)

    itemsize = jnp.dtype(x.dtype).itemsize
    TB, TF = _choose_tiles(B, F, itemsize)
    grid = (pl.cdiv(B, TB), pl.cdiv(F, TF))

    # Per-row scale: floor(keep_prob + U[0,1)) / keep_prob  ->  0 or 1/keep_prob,
    # computed once here and delivered to the kernel in x.dtype.
    u = jax.random.uniform(key, (B, 1), dtype=jnp.float32)
    scale = (jnp.floor(jnp.float32(keep_prob) + u)
             * (1.0 / jnp.float32(keep_prob))).astype(x.dtype)

    # Pad the resident scale block to a TB multiple so the in-kernel row slice
    # never reads out of bounds on a ragged last batch block (padded rows only
    # multiply padded x rows, which are masked out of the output writeback).
    B_pad = grid[0] * TB
    if B_pad != B:
        scale = jnp.pad(scale, ((0, B_pad - B), (0, 0)))

    out = pl.pallas_call(
        functools.partial(_drop_path_kernel, TB),
        out_shape=jax.ShapeDtypeStruct((B, F), x.dtype),
        grid=grid,
        in_specs=[
            pl.BlockSpec((B_pad, 1), lambda i, j: (0, 0)),   # resident scale
            pl.BlockSpec((TB, TF), lambda i, j: (i, j)),     # input tile
        ],
        out_specs=pl.BlockSpec((TB, TF), lambda i, j: (i, j)),
        compiler_params=pltpu.CompilerParams(
            dimension_semantics=("parallel", "parallel"),
            vmem_limit_bytes=_VMEM_LIMIT_BYTES,
        ),
    )(scale, xf)

    return out.reshape(orig_shape)


# -------------------------------- demo / test --------------------------------

if __name__ == "__main__":
    root = jax.random.PRNGKey(0)
    keys = jax.random.split(root, 6)

    drop_prob = 0.5
    keep_prob = 1.0 - drop_prob

    # --- small NCHW f32 case (matches the module's typical use) ---
    x = jax.random.normal(keys[0], (2, 4, 16, 16), dtype=jnp.float32)
    y = jax.block_until_ready(drop_path(x, drop_prob=drop_prob, key=keys[1], training=True))
    x2 = x.reshape(x.shape[0], -1)
    y2 = y.reshape(y.shape[0], -1)
    for b in range(x.shape[0]):
        is_zero = bool(jnp.all(y2[b] == 0.0))
        is_kept = bool(jnp.allclose(y2[b], x2[b] / keep_prob, rtol=1e-6, atol=1e-6))
        assert is_zero or is_kept, f"row {b}: invalid drop-path output"

    # --- larger batch in bf16 (native 16-row sublane tiles) ---
    xb = jax.random.normal(keys[2], (16, 8, 8, 8), dtype=jnp.bfloat16)
    yb = jax.block_until_ready(drop_path(xb, drop_prob=drop_prob, key=keys[3], training=True))
    xb2 = xb.astype(jnp.float32).reshape(xb.shape[0], -1)
    yb2 = yb.astype(jnp.float32).reshape(yb.shape[0], -1)
    for b in range(xb.shape[0]):
        is_zero = bool(jnp.all(yb2[b] == 0.0))
        is_kept = bool(jnp.allclose(yb2[b], xb2[b] / keep_prob, rtol=2e-2, atol=2e-2))
        assert is_zero or is_kept, f"bf16 row {b}: invalid drop-path output"

    # --- odd feature extent (F=300, not a multiple of 128): exercises the
    #     cdiv grid + masked ragged boundary block ---
    dp2 = 0.3
    kp2 = 1.0 - dp2
    xo = jax.random.normal(keys[4], (4, 3, 10, 10), dtype=jnp.float32)
    yo = jax.block_until_ready(drop_path(xo, drop_prob=dp2, key=keys[5], training=True))
    xo2 = xo.reshape(xo.shape[0], -1)
    yo2 = yo.reshape(yo.shape[0], -1)
    for b in range(xo.shape[0]):
        is_zero = bool(jnp.all(yo2[b] == 0.0))
        is_kept = bool(jnp.allclose(yo2[b], xo2[b] / kp2, rtol=1e-5, atol=1e-6))
        assert is_zero or is_kept, f"odd-F row {b}: invalid drop-path output"

    # --- eval / drop_prob == 0 paths are identity (no kernel launch) ---
    y_eval = jax.block_until_ready(drop_path(x, drop_prob=drop_prob, key=keys[1], training=False))
    assert bool(jnp.all(y_eval == x))
    y_nodrop = jax.block_until_ready(drop_path(x, drop_prob=0.0, key=keys[1], training=True))
    assert bool(jnp.all(y_nodrop == x))

    print("KERNEL_OK")
</pallas_src>

<mosaic_0001>
module attributes {stable_mosaic.version = 11 : i64} {
  func.func @_drop_path_kernel(%arg0: i32, %arg1: i32, %arg2: memref<2x1xf32, #tpu.memory_space<vmem>>, %arg3: memref<2x512xf32, #tpu.memory_space<vmem>>, %arg4: memref<2x512xf32, #tpu.memory_space<vmem>>) attributes {dimension_semantics = [#tpu.dimension_semantics<parallel>, #tpu.dimension_semantics<parallel>], iteration_bounds = array<i64: 1, 2>, scalar_prefetch = 0 : i64, scratch_operands = 0 : i64, tpu.core_type = #tpu.core_type<tc>, window_params = [{pipeline_mode = #tpu.pipeline_mode<synchronous>, transform_indices = @transform_0, window_bounds = array<i64: 2, 1>}, {transform_indices = @transform_1, window_bounds = array<i64: 2, 512>}, {transform_indices = @transform_2, window_bounds = array<i64: 2, 512>}]} {
    %c2_i32 = arith.constant 2 : i32
    %0 = arith.muli %arg0, %c2_i32 : i32
    %1 = tpu.assume_multiple %0, 2 : i32
    %2 = arith.index_cast %1 : i32 to index
    %c0 = arith.constant 0 : index
    %3 = vector.load %arg2[%2, %c0] : memref<2x1xf32, #tpu.memory_space<vmem>>, vector<2x1xf32>
    %c0_0 = arith.constant 0 : index
    %c0_1 = arith.constant 0 : index
    %4 = vector.load %arg3[%c0_0, %c0_1] : memref<2x512xf32, #tpu.memory_space<vmem>>, vector<2x512xf32>
    %5 = vector.broadcast %3 : vector<2x1xf32> to vector<2x512xf32>
    %6 = arith.mulf %4, %5 : vector<2x512xf32>
    %c0_2 = arith.constant 0 : index
    %c0_3 = arith.constant 0 : index
    %7 = vector.load %arg4[%c0_2, %c0_3] : memref<2x512xf32, #tpu.memory_space<vmem>>, vector<2x512xf32>
    tpu.vector_store %arg4[%c0_2, %c0_3], %6 {strides = array<i32>} : memref<2x512xf32, #tpu.memory_space<vmem>>, vector<2x512xf32>,
    return
  }
  func.func @transform_0(%arg0: i32, %arg1: i32) -> (i32, i32) {
    %c0_i32 = arith.constant 0 : i32
    %c0_i32_0 = arith.constant 0 : i32
    %c0_i32_1 = arith.constant 0 : i32
    return %c0_i32, %c0_i32_0 : i32, i32
  }
  func.func @transform_1(%arg0: i32, %arg1: i32) -> (i32, i32) {
    %c0_i32 = arith.constant 0 : i32
    return %arg0, %arg1 : i32, i32
  }
  func.func @transform_2(%arg0: i32, %arg1: i32) -> (i32, i32) {
    %c0_i32 = arith.constant 0 : i32
    return %arg0, %arg1 : i32, i32
  }
}

</mosaic_0001>

<bundles_post_ra>
// kernel: tpu_custom_call.1
= control target key start
LH: loop header
LB: loop body
LE: loop exit
PB: predicated region body
PF: predicated region fallthrough
CT: control target
= control target key end

     0   :  { %7 = vsyncpa [#allocation3], 0  ;;  %s649_s0 = inlined_call_operand.vmem [shape: f32[2,1], index: 0, kind: input, shape index: {}]   ;;  %s650_s1 = inlined_call_operand.hbm [shape: f32[2,1024], index: 1, kind: input, shape index: {}]   ;;  %s651_s2 = inlined_call_operand.hbm [shape: f32[2,1024], index: 2, kind: output, shape index: {}]  }
   0x1   :  { %9 = vsyncpa [#allocation3 + $0x1], 0 }
   0x2   :  { %10 = vsyncpa [#allocation4], 0 }
   0x3   :  { %12 = vsyncpa [#allocation4 + $0x1], 0  ;;  %s512_s9 = smov 0   ;;  %s514_s10 = smov 0  }
   0x4   :  { %s516_s11 = smov 0   ;;  %s518_s12 = smov 0  }
   0x5   :  { %s520_s13 = smov 0   ;;  %s522_s14 = smov 0  }
   0x6 LB: > { %s301_s15 = sadd.s32 4294967295, %s491_s14   ;;  %s302_s16 = sadd.s32 4294967294, %s491_s14   ;;  %s491_s14 = sphi %s522_s14, %s18_s14   ;;  %s487_s13 = sphi %s520_s13, %s663_s13   ;;  %s483_s12 = sphi %s518_s12, %s662_s12   ;;  %s479_s11 = sphi %s516_s11, %s661_s11   ;;  %s475_s10 = sphi %s514_s10, %s660_s10   ;;  %s471_s9 = sphi %s512_s9, %s659_s9  }
   0x7   : > { %s27_s17 = sadd.s32 1, %s487_s13  ;;  %s60_s18 = sadd.s32 1, %s479_s11 }
   0x8   : > { %p28_p0 = scmp.ge.s32.totalorder %s27_s17, 2  ;;  %p67_p1 = scmp.ne.s32.totalorder %s479_s11, %s475_s10 }
   0x9   : > { %p68_p2 = scmp.eq.s32.totalorder %s491_s14, 0  ;;  %p73_p3 = scmp.ne.s32.totalorder %s475_s10, %s471_s9 }
   0xa   : > { %s665_s17 = smov (%p28_p0, %s27_s17), 0  ;;  %p74_p5 = scmp.eq.s32.totalorder %s301_s15, 0 }
   0xb   : > { %p553_p4 = por %p68_p2, %p67_p1  ;;  %s56_s20 = ssub.s32 %s487_s13, %s665_s17 }
   0xc   : > { %p99_p6 = scmp.eq.s32.totalorder %s301_s15, 1  ;;  %p58_p7 = scmp.eq.s32.totalorder %s56_s20, 0 }
   0xd   : > { %p559_p8 = por %p74_p5, %p73_p3  ;;  %p105_p10 = scmp.eq.s32.totalorder %s302_s16, 1 }
   0xe   : > { %p563_p9 = por %p99_p6, %p67_p1  ;;  %p330_p13 = scmp.lt.s32.totalorder %s491_s14, 2 }
   0xf   : > { %s568_s23 = scalar_select %p58_p7, %s479_s11, %s60_s18  }
  0x10   : > { %p570_p11 = por %p105_p10, %p73_p3  ;;  %s128_s25 = sand.u32 1, %s479_s11  }
  0x11   : > { %s305_s26 = sshll.u32 %s128_s25, 3  ;;  %s316_s27 = sshll.u32 %s487_s13, 7 }
  0x12   : > { %s655_s24 = scalar_select %p570_p11, 1, 0 }
  0x13   : > { %s140_s30 = scalar_lea.hbm %s650_s1, %s316_s27  ;;  %s132_s3 = scalar_lea.vmem [#allocation2], %s305_s26 }
  0x14   : > { %s142_s4 = sshll.u32 %s132_s3, 4  ;;  %p583_p0 = pnand %p330_p13, %p553_p4  ;;  %s143_s4 = int_to_ptr.vmem [resolvable:$true] %s142_s4 }
  0x15   : > { %p308_p1 = scmp.ge.s32.totalorder %s491_s14, 1  ;;  %p147_p2 = scmp.lt.s32.totalorder %s491_s14, 3 }
  0x16   : > { %s129_s6 = scalar_lea.sflag [#allocation3], %s128_s25  ;;  %p385_p3 = pneg %p583_p0 }
  0x17   : > { %s396_s7 = scalar_lea.vmem %s143_s4, 128  ;;  %s493_s8 = smov [#allocation2]  }
  0x18   : > { %p397_p5 = scmp.ne.s32.totalorder %s143_s4, %s396_s7  ;;  %s401_s15 = sshll.u32 %s493_s8, 4  ;;  %s402_s15 = int_to_ptr.vmem [resolvable:$false] %s401_s15 }
  0x19   : > { %s403_s16 = scalar_lea.vmem %s402_s15, 256  ;;  %p404_p10 = scmp.lt.s32.totalorder %s143_s4, %s402_s15 }
  0x1a   : > { %p399_p6 = pnand %p397_p5, %p385_p3  ;;  %p405_p12 = scmp.lt.s32.totalorder %s403_s16, %s396_s7 }
  0x1c   : > { %p400_p7 = pneg %p399_p6  ;;  %p406_p4 = por %p405_p12, %p404_p10 }
  0x1e   : > { %p407_p13 = pnand %p406_p4, %p400_p7 }
  0x20   : > { %410 = shalt.err (!%p407_p13)
}
  0x21   : > { %325 = dma.hbm_to_vmem [thread:$0]  (!%p583_p0), %s140_s30, 128, %s143_s4, %s129_s6  }
  0x22   : > { %p148_p11 = pnand %p308_p1, %p147_p2 }
  0x23   : > { %s598_s18 = sand.u32 (!%p148_p11), 1, %s475_s10  }
  0x24   : > { %151 = sbr.rel (%p148_p11) target bundleno = 185 (0xb9), region = 28  ;;  %s309_s19 = sshll.u32 (!%p148_p11), %s598_s18, 3 }
  0x25   : > { %s154_s20 = scalar_lea.sflag (!%p148_p11), [#allocation3], %s598_s18  ;;  %s157_s25 = scalar_lea.vmem (!%p148_p11), [#allocation2], %s309_s19 }
  0x29   : > { %462 = dma.done.wait (%p559_p8), %s154_s20, 128  }
  0x2a   : > { %464 = vsyncadd (%p559_p8), %s154_s20, 4294967168  ;;  %v494_v0 = vmov 0   ;;  %v182_v1 = vld [vmem:[%s649_s0] sm:$0x3]  ;;  %v495_v2 = vmov 269488144   ;;  %v191_v4 = vlaneseq }
  0x2b   : > { %382 = vset.pattern.permute.xlu0 %v494_v0  ;;  %v189_v3 = vunpack.c.l.s4 %v495_v2  ;;  %v183_v8 = vld [vmem:[%s157_s25] sm:$0xff]  ;;  %s317_s21 = sshll.u32 %s483_s12, 7  ;;  %s177_s28 = scalar_lea.vmem [#allocation5], %s309_s19 }
  0x2c   : > { %186 = vperm.xlu0 %382, %v182_v1   ;;  %v192_v6 = vshrl.u32 %v191_v4, 7  ;;  %s215_s29 = sshll.u32 %s177_s28, 4  ;;  %s213_s4 = scalar_lea.hbm %s651_s2, %s317_s21  ;;  %s216_s29 = int_to_ptr.vmem [resolvable:$true] %s215_s29 }
  0x2d   : > { %v190_v5 = vunpack.c.0.s8 %v189_v3  ;;  %s199_s5 = scalar_lea.sflag [#allocation4], %s598_s18  ;;  %s411_s6 = scalar_lea.vmem %s216_s29, 128 }
  0x2e   : > { %p412_p8 = scmp.ne.s32.totalorder %s216_s29, %s411_s6  ;;  %s496_s7 = smov [#allocation5]  }
  0x2f   : > { %v193_v7 = vsub.s32 %v190_v5, %v192_v6  ;;  %s415_s8 = sshll.u32 %s496_s7, 4  ;;  %s416_s8 = int_to_ptr.vmem [resolvable:$false] %s415_s8 }
  0x30   : > { %p413_p11 = pnand %p412_p8, %p563_p9  ;;  %s417_s12 = scalar_lea.vmem %s416_s8, 256 }
  0x31   : > { %p418_p0 = scmp.lt.s32.totalorder %s216_s29, %s416_s8  ;;  %p419_p1 = scmp.lt.s32.totalorder %s417_s12, %s411_s6 }
  0x32   : > { %p414_p12 = pneg %p413_p11 }
  0x33   : > { %p420_p2 = por %p419_p1, %p418_p0 }
  0x35   : > { %p421_p3 = pnand %p420_p2, %p414_p12 }
  0xa7   : > { %v187_v9 = vpop.permute.xlu0 %186 }
  0xa8   : > { %v194_v10 = vrot.slane %v187_v9, %v193_v7 }
  0xaa   : > { %v196_v11 = vmul.f32 %v194_v10, %v183_v8 }
  0xac   : > { %197 = vst [vmem:[%s177_s28] sm:$0xff] %v196_v11 }
  0xad   : > { %424 = shalt.err (!%p421_p3)
}
  0xae   : > { %s425_s15 = scalar_lea.hbm %s213_s4, 128  ;;  %s429_s19 = scalar_lea.hbm %s651_s2, 256 }
  0xaf   : > { %p426_p5 = scmp.ne.s32.totalorder %s213_s4, %s425_s15  ;;  %p430_p10 = scmp.lt.s32.totalorder %s213_s4, %s651_s2 }
  0xb0   : > { %p431_p4 = scmp.lt.s32.totalorder %s429_s19, %s425_s15 }
  0xb1   : > { %p427_p6 = pnand %p426_p5, %p563_p9 }
  0xb2   : > { %p432_p13 = por %p431_p4, %p430_p10 }
  0xb3   : > { %p428_p7 = pneg %p427_p6 }
  0xb5   : > { %p433_p8 = pnand %p432_p13, %p428_p7 }
  0xb7   : > { %436 = shalt.err (!%p433_p8)
}
  0xb8   : > { %320 = dma.vmem_to_hbm [thread:$0]  (%p563_p9), %s216_s29, 128, %s213_s4, %s199_s5  }
  0xb9 PF: > { %s227_s26 = sand.u32 1, %s471_s9   ;;  %p657_p11 = scmp.ne.s32.totalorder %s655_s24, 0 }
  0xba   : > { %p658_p12 = scmp.ge.s32.totalorder %s491_s14, 2  ;;  %s228_s27 = scalar_lea.sflag [#allocation4], %s227_s26 }
  0xbc   : > { %p327_p0 = pnand %p658_p12, %p657_p11 }
  0xbe   : > { %p328_p1 = pneg %p327_p0 }
  0xc0   : > { %466 = dma.done.wait (%p328_p1), %s228_s27, 128  }
  0xc1   : > { %468 = vsyncadd (%p328_p1), %s228_s27, 4294967168  ;;  %s18_s14 = sadd.s32 1, %s491_s14   ;;  %s659_s9 = smov %s475_s10 }
  0xc2   : > { %p15_p2 = scmp.ge.s32.totalorder %s18_s14, 4   ;;  %s660_s10 = smov %s479_s11 }
  0xc3   : > { %s661_s11 = smov %s568_s23  ;;  %s662_s12 = smov %s487_s13 }
  0xc4   : > { %s663_s13 = smov %s665_s17  ;;  %17 = sbr.rel (!%p15_p2) target bundleno = 6 (0x6), region = 74 }
  0xc9   :  { %233 = vsyncpa [#allocation3], 1 }
  0xca   :  { %235 = vsyncpa [#allocation3 + $0x1], 1 }
  0xcb   :  { %236 = vsyncpa [#allocation4], 1 }
  0xcc   :  { %238 = vsyncpa [#allocation4 + $0x1], 1 }

</bundles_post_ra>
